<compile_context>
chip_gen: v7x
topology: tpu7x:2x2x1
jax: 0.10.0
libtpu: 0.0.40
codegen_flags: <defaults>
</compile_context>

<pallas_src>
import jax
import jax.numpy as jnp
from jax.experimental import pallas as pl
from jax.experimental.pallas import tpu as pltpu

NUM_FEATURES = 1280      # efficientnetv2_s backbone.num_features
HIDDEN = 128             # classifier hidden width
OUT_LANES = 128          # lane-dense output slab width
PARAM_ROWS = 8           # padded param-slab sublanes
ROW_BFOLD = 4            # slab row holding the folded bias
ROW_W2 = 5               # slab row holding classifier[3] weight
ROW_B2 = 6               # slab row holding classifier[3] bias (lane 0)
MAX_BLOCK_BYTES = 8 * 1024 * 1024   # target image-block size (2x for double buffering)


def _cdiv(a, b):
    return -(-a // b)


def _make_liveness_kernel(chans, h_img, tile_h, inv_hw, mask_tail):
    """chans: channels streamed (1 for grayscale, 3 for RGB); inv_hw: 1/(H*W)."""

    def kernel(x_ref, p_ref, out_ref, acc_ref):
        j = pl.program_id(1)

        @pl.when(j == 0)
        def _init():
            acc_ref[...] = jnp.zeros_like(acc_ref)

        # GAP accumulation: stream the raw image block, cast to f32 in-register only.
        x = x_ref[0].astype(jnp.float32)                         # [chans, tile_h, W]
        if mask_tail:
            # Last H-tile may overhang the image; zero the out-of-bounds rows.
            row = jax.lax.broadcasted_iota(jnp.int32, x.shape, 1) + j * tile_h
            x = jnp.where(row < h_img, x, 0.0)
        s = jnp.sum(x, axis=1)                                   # [chans, W]  (sublane reduce)
        acc_ref[...] += jnp.sum(s, axis=-1, keepdims=True)       # [chans, 1]  (lane reduce)

        @pl.when(j == pl.num_programs(1) - 1)
        def _finalize():
            # Folded classifier layer 1: h = GAP @ w_fold + b_fold, with the tiny
            # channel contraction unrolled as VPU broadcast multiply-adds.
            h = p_ref[ROW_BFOLD:ROW_BFOLD + 1, :]                # [1, 128]
            for c in range(chans):
                gap_c = acc_ref[c:c + 1, 0:1] * inv_hw           # [1, 1]
                h = h + gap_c * p_ref[c:c + 1, :]                # [1, 128]
            h = jnp.maximum(h, 0.0)                              # ReLU
            # TODO(synk): Dropout(0.3) is eval-mode identity; stochastic dropout not implemented.
            logit = (jnp.sum(h * p_ref[ROW_W2:ROW_W2 + 1, :], axis=-1, keepdims=True)
                     + p_ref[ROW_B2:ROW_B2 + 1, 0:1])            # [1, 1]
            prob = 1.0 / (1.0 + jnp.exp(-logit))                 # sigmoid (EUP exp)
            # Lane-dense output slab; wrapper slices column 0.
            out_ref[...] = jnp.broadcast_to(prob, (1, OUT_LANES)).reshape(1, 1, OUT_LANES)

    return kernel


def liveness_forward(x, params, *, max_block_bytes=MAX_BLOCK_BYTES):
    """x: NCHW float image batch. params: folded (w_fold, b_fold, w2, b2). Returns [B] scores."""
    w_fold, b_fold, w2, b2 = params
    B, C, H, W = x.shape
    hw = H * W

    if C == 1:
        # `x.repeat(1, 3, 1, 1)` followed by GAP gives identical per-channel means, so fold
        # the repeat into the weights instead of tripling the image DMA.
        w_eff = jnp.sum(w_fold, axis=0, keepdims=True)            # [1, 128]
        chans = 1
    else:
        assert C == w_fold.shape[0], "expected 3-channel input"
        w_eff = w_fold                                            # [3, 128]
        chans = C

    # Single (8,128) param slab: folded weight rows + folded bias + classifier w2/b2.
    slab = jnp.zeros((PARAM_ROWS, HIDDEN), jnp.float32)
    slab = slab.at[0:chans, :].set(w_eff.astype(jnp.float32))
    slab = slab.at[ROW_BFOLD, :].set(b_fold[0].astype(jnp.float32))
    slab = slab.at[ROW_W2, :].set(w2[0].astype(jnp.float32))
    slab = slab.at[ROW_B2, 0].set(b2[0, 0].astype(jnp.float32))

    # Block selection: whole image per batch element when it fits the block budget
    # (typical case -> the spatial grid axis collapses to a single step); otherwise tile
    # along H in 8-row multiples and mask the overhanging tail rows in-kernel.
    itemsize = jnp.dtype(x.dtype).itemsize
    img_bytes = chans * H * W * itemsize
    if img_bytes <= max_block_bytes or H <= 8:
        tile_h = H
    else:
        tile_h = max(8, (max_block_bytes // (chans * W * itemsize)) // 8 * 8)
        tile_h = min(tile_h, H)
    n_h = _cdiv(H, tile_h)
    mask_tail = (H % tile_h) != 0

    kernel = _make_liveness_kernel(chans, H, tile_h, 1.0 / float(hw), mask_tail)

    out = pl.pallas_call(
        kernel,
        out_shape=jax.ShapeDtypeStruct((B, 1, OUT_LANES), jnp.float32),
        grid_spec=pltpu.PrefetchScalarGridSpec(
            num_scalar_prefetch=0,
            grid=(B, n_h),
            in_specs=[
                # Stream the original NCHW layout directly (no pre-kernel pack/cast pass).
                pl.BlockSpec((1, chans, tile_h, W), lambda b, j: (b, 0, j, 0)),
                pl.BlockSpec((PARAM_ROWS, HIDDEN), lambda b, j: (0, 0)),
            ],
            out_specs=pl.BlockSpec((1, 1, OUT_LANES), lambda b, j: (b, 0, 0)),
            scratch_shapes=[pltpu.VMEM((chans, 1), jnp.float32)],
        ),
        compiler_params=pltpu.CompilerParams(
            # Batch axis parallel (both v7x TensorCores when B >= 2); spatial axis is a
            # reduction.  Keep the scoped-VMEM limit portable across v5e/v6e/v7x.
            dimension_semantics=("parallel", "arbitrary"),
            vmem_limit_bytes=32 * 1024 * 1024,
        ),
    )(x, slab)

    return out[:, 0, 0]


def init_params(key, in_chans=3):
    """Build stand-in backbone projection + classifier weights and fold them offline."""
    k0, k1, k2, k3 = jax.random.split(key, 4)
    wp = jax.random.normal(k0, (in_chans, NUM_FEATURES), jnp.float32) * 0.1
    bp = jnp.zeros((1, NUM_FEATURES), jnp.float32)
    w1 = jax.random.normal(k1, (NUM_FEATURES, HIDDEN), jnp.float32) * (NUM_FEATURES ** -0.5)
    b1 = jax.random.normal(k2, (1, HIDDEN), jnp.float32) * 0.01
    w2 = jax.random.normal(k3, (1, HIDDEN), jnp.float32) * (HIDDEN ** -0.5)
    b2 = jnp.zeros((1, 1), jnp.float32)
    # Offline fold: GAP -> (.@wp + bp) -> (.@w1 + b1) is linear, collapse into one layer.
    w_fold = wp @ w1                  # [in_chans, 128]
    b_fold = bp @ w1 + b1             # [1, 128]
    return (w_fold, b_fold, w2, b2)


def _reference(x, params):
    """Pure-JAX f32 reference on the same folded weights."""
    w_fold, b_fold, w2, b2 = params
    B, C, H, W = x.shape
    if C == 1:
        x = jnp.repeat(x, 3, axis=1)
    gap = jnp.mean(x.astype(jnp.float32).reshape(B, 3, H * W), axis=-1)   # [B, 3]
    h = jnp.maximum(gap @ w_fold + b_fold, 0.0)                           # [B, 128]
    logit = jnp.sum(h * w2, axis=-1, keepdims=True) + b2                  # [B, 1]
    return (1.0 / (1.0 + jnp.exp(-logit)))[:, 0]


if __name__ == "__main__":
    key = jax.random.PRNGKey(0)
    k_x, k_p = jax.random.split(key)

    # Small NCHW image batch: batch=2, channels=3, spatial=16x16 (single block per image).
    x = jax.random.normal(k_x, (2, 3, 16, 16), jnp.float32)
    params = init_params(k_p, in_chans=3)

    out = jax.block_until_ready(liveness_forward(x, params))
    assert out.shape == (2,)
    assert bool(jnp.all((out >= 0.0) & (out <= 1.0)))
    ref = _reference(x, params)
    assert float(jnp.max(jnp.abs(out - ref))) < 1e-4

    # Grayscale path: channel repeat folded into the weights (no 3x image copy).
    x_gray = jax.random.normal(k_x, (2, 1, 16, 16), jnp.float32)
    out_gray = jax.block_until_ready(liveness_forward(x_gray, params))
    assert out_gray.shape == (2,)
    ref_gray = _reference(x_gray, params)
    assert float(jnp.max(jnp.abs(out_gray - ref_gray))) < 1e-4

    # Force the tiled + masked-tail path with a tiny block budget (H=24, tile_h=16).
    x_tall = jax.random.normal(k_x, (2, 3, 24, 16), jnp.float32)
    out_tall = jax.block_until_ready(
        liveness_forward(x_tall, params, max_block_bytes=3 * 16 * 16 * 4))
    ref_tall = _reference(x_tall, params)
    assert float(jnp.max(jnp.abs(out_tall - ref_tall))) < 1e-4

    print("KERNEL_OK")
</pallas_src>

<mosaic_0001>
module attributes {stable_mosaic.version = 11 : i64} {
  func.func @kernel(%arg0: i32, %arg1: i32, %arg2: memref<1x3x16x16xf32, #tpu.memory_space<vmem>>, %arg3: memref<8x128xf32, #tpu.memory_space<vmem>>, %arg4: memref<1x1x128xf32, #tpu.memory_space<vmem>>, %arg5: memref<3x1xf32, #tpu.memory_space<vmem>>) attributes {dimension_semantics = [#tpu.dimension_semantics<parallel>, #tpu.dimension_semantics<arbitrary>], iteration_bounds = array<i64: 2, 1>, scalar_prefetch = 0 : i64, scratch_operands = 1 : i64, tpu.core_type = #tpu.core_type<tc>, window_params = [{transform_indices = @transform_0, window_bounds = array<i64: 1, 3, 16, 16>}, {pipeline_mode = #tpu.pipeline_mode<synchronous>, transform_indices = @transform_1, window_bounds = array<i64: 8, 128>}, {transform_indices = @transform_2, window_bounds = array<i64: 1, 1, 128>}]} {
    %c0_i32 = arith.constant 0 : i32
    %0 = arith.cmpi eq, %arg1, %c0_i32 : i32
    %1 = arith.extui %0 : i1 to i32
    %c0_i32_0 = arith.constant 0 : i32
    %2 = arith.cmpi ne, %1, %c0_i32_0 : i32
    scf.if %2 {
      %cst_11 = arith.constant 0.000000e+00 : f32
      %14 = vector.broadcast %cst_11 : f32 to vector<3x1xf32>
      %c0_12 = arith.constant 0 : index
      %c0_13 = arith.constant 0 : index
      %15 = vector.load %arg5[%c0_12, %c0_13] : memref<3x1xf32, #tpu.memory_space<vmem>>, vector<3x1xf32>
      tpu.vector_store %arg5[%c0_12, %c0_13], %14 {strides = array<i32>} : memref<3x1xf32, #tpu.memory_space<vmem>>, vector<3x1xf32>,
    } else {
    }
    %c0 = arith.constant 0 : index
    %c0_1 = arith.constant 0 : index
    %c0_2 = arith.constant 0 : index
    %c0_3 = arith.constant 0 : index
    %3 = vector.load %arg2[%c0, %c0_1, %c0_2, %c0_3] : memref<1x3x16x16xf32, #tpu.memory_space<vmem>>, vector<1x3x16x16xf32>
    %4 = vector.shape_cast %3 : vector<1x3x16x16xf32> to vector<3x16x16xf32>
    %cst = arith.constant dense<0.000000e+00> : vector<3x16xf32>
    %5 = vector.multi_reduction <add>, %4, %cst [1] : vector<3x16x16xf32> to vector<3x16xf32>
    %c0_4 = arith.constant 0 : index
    %c0_5 = arith.constant 0 : index
    %6 = vector.load %arg5[%c0_4, %c0_5] : memref<3x1xf32, #tpu.memory_space<vmem>>, vector<3x1xf32>
    %cst_6 = arith.constant dense<0.000000e+00> : vector<3xf32>
    %7 = vector.multi_reduction <add>, %5, %cst_6 [1] : vector<3x16xf32> to vector<3xf32>
    %8 = vector.shape_cast %7 : vector<3xf32> to vector<3x1xf32>
    %9 = arith.addf %6, %8 : vector<3x1xf32>
    %c0_7 = arith.constant 0 : index
    %c0_8 = arith.constant 0 : index
    %10 = vector.load %arg5[%c0_7, %c0_8] : memref<3x1xf32, #tpu.memory_space<vmem>>, vector<3x1xf32>
    tpu.vector_store %arg5[%c0_7, %c0_8], %9 {strides = array<i32>} : memref<3x1xf32, #tpu.memory_space<vmem>>, vector<3x1xf32>,
    %c0_i32_9 = arith.constant 0 : i32
    %11 = arith.cmpi eq, %arg1, %c0_i32_9 : i32
    %12 = arith.extui %11 : i1 to i32
    %c0_i32_10 = arith.constant 0 : i32
    %13 = arith.cmpi ne, %12, %c0_i32_10 : i32
    scf.if %13 {
      %c4 = arith.constant 4 : index
      %c0_11 = arith.constant 0 : index
      %14 = vector.load %arg3[%c4, %c0_11] : memref<8x128xf32, #tpu.memory_space<vmem>>, vector<1x128xf32>
      %c0_12 = arith.constant 0 : index
      %c0_13 = arith.constant 0 : index
      %15 = vector.load %arg5[%c0_12, %c0_13] : memref<3x1xf32, #tpu.memory_space<vmem>>, vector<1x1xf32>
      %cst_14 = arith.constant 3.906250e-03 : f32
      %16 = vector.broadcast %cst_14 : f32 to vector<1x1xf32>
      %17 = arith.mulf %15, %16 : vector<1x1xf32>
      %c0_15 = arith.constant 0 : index
      %c0_16 = arith.constant 0 : index
      %18 = vector.load %arg3[%c0_15, %c0_16] : memref<8x128xf32, #tpu.memory_space<vmem>>, vector<1x128xf32>
      %19 = vector.broadcast %17 : vector<1x1xf32> to vector<1x128xf32>
      %20 = arith.mulf %19, %18 : vector<1x128xf32>
      %21 = arith.addf %14, %20 : vector<1x128xf32>
      %c1 = arith.constant 1 : index
      %c0_17 = arith.constant 0 : index
      %22 = vector.load %arg5[%c1, %c0_17] : memref<3x1xf32, #tpu.memory_space<vmem>>, vector<1x1xf32>
      %cst_18 = arith.constant 3.906250e-03 : f32
      %23 = vector.broadcast %cst_18 : f32 to vector<1x1xf32>
      %24 = arith.mulf %22, %23 : vector<1x1xf32>
      %c1_19 = arith.constant 1 : index
      %c0_20 = arith.constant 0 : index
      %25 = vector.load %arg3[%c1_19, %c0_20] : memref<8x128xf32, #tpu.memory_space<vmem>>, vector<1x128xf32>
      %26 = vector.broadcast %24 : vector<1x1xf32> to vector<1x128xf32>
      %27 = arith.mulf %26, %25 : vector<1x128xf32>
      %28 = arith.addf %21, %27 : vector<1x128xf32>
      %c2 = arith.constant 2 : index
      %c0_21 = arith.constant 0 : index
      %29 = vector.load %arg5[%c2, %c0_21] : memref<3x1xf32, #tpu.memory_space<vmem>>, vector<1x1xf32>
      %cst_22 = arith.constant 3.906250e-03 : f32
      %30 = vector.broadcast %cst_22 : f32 to vector<1x1xf32>
      %31 = arith.mulf %29, %30 : vector<1x1xf32>
      %c2_23 = arith.constant 2 : index
      %c0_24 = arith.constant 0 : index
      %32 = vector.load %arg3[%c2_23, %c0_24] : memref<8x128xf32, #tpu.memory_space<vmem>>, vector<1x128xf32>
      %33 = vector.broadcast %31 : vector<1x1xf32> to vector<1x128xf32>
      %34 = arith.mulf %33, %32 : vector<1x128xf32>
      %35 = arith.addf %28, %34 : vector<1x128xf32>
      %cst_25 = arith.constant 0.000000e+00 : f32
      %36 = vector.broadcast %cst_25 : f32 to vector<1x128xf32>
      %37 = arith.maximumf %35, %36 : vector<1x128xf32>
      %c5 = arith.constant 5 : index
      %c0_26 = arith.constant 0 : index
      %38 = vector.load %arg3[%c5, %c0_26] : memref<8x128xf32, #tpu.memory_space<vmem>>, vector<1x128xf32>
      %39 = arith.mulf %37, %38 : vector<1x128xf32>
      %cst_27 = arith.constant dense<0.000000e+00> : vector<1xf32>
      %40 = vector.multi_reduction <add>, %39, %cst_27 [1] : vector<1x128xf32> to vector<1xf32>
      %41 = vector.shape_cast %40 : vector<1xf32> to vector<1x1xf32>
      %c6 = arith.constant 6 : index
      %c0_28 = arith.constant 0 : index
      %42 = vector.load %arg3[%c6, %c0_28] : memref<8x128xf32, #tpu.memory_space<vmem>>, vector<1x1xf32>
      %43 = arith.addf %41, %42 : vector<1x1xf32>
      %cst_29 = arith.constant 0.000000e+00 : f32
      %44 = vector.broadcast %cst_29 : f32 to vector<1x1xf32>
      %45 = arith.subf %44, %43 : vector<1x1xf32>
      %46 = math.exp %45 : vector<1x1xf32>
      %cst_30 = arith.constant 1.000000e+00 : f32
      %47 = vector.broadcast %cst_30 : f32 to vector<1x1xf32>
      %48 = arith.addf %47, %46 : vector<1x1xf32>
      %cst_31 = arith.constant 1.000000e+00 : f32
      %49 = vector.broadcast %cst_31 : f32 to vector<1x1xf32>
      %50 = arith.divf %49, %48 : vector<1x1xf32>
      %51 = vector.shape_cast %50 : vector<1x1xf32> to vector<1x1xf32>
      %52 = vector.broadcast %51 : vector<1x1xf32> to vector<1x128xf32>
      %53 = vector.shape_cast %52 : vector<1x128xf32> to vector<1x1x128xf32>
      %c0_32 = arith.constant 0 : index
      %c0_33 = arith.constant 0 : index
      %c0_34 = arith.constant 0 : index
      %54 = vector.load %arg4[%c0_32, %c0_33, %c0_34] : memref<1x1x128xf32, #tpu.memory_space<vmem>>, vector<1x1x128xf32>
      tpu.vector_store %arg4[%c0_32, %c0_33, %c0_34], %53 {strides = array<i32>} : memref<1x1x128xf32, #tpu.memory_space<vmem>>, vector<1x1x128xf32>,
    } else {
    }
    return
  }
  func.func @transform_0(%arg0: i32, %arg1: i32) -> (i32, i32, i32, i32) {
    %c0_i32 = arith.constant 0 : i32
    %c0_i32_0 = arith.constant 0 : i32
    %c0_i32_1 = arith.constant 0 : i32
    return %arg0, %c0_i32, %arg1, %c0_i32_0 : i32, i32, i32, i32
  }
  func.func @transform_1(%arg0: i32, %arg1: i32) -> (i32, i32) {
    %c0_i32 = arith.constant 0 : i32
    %c0_i32_0 = arith.constant 0 : i32
    %c0_i32_1 = arith.constant 0 : i32
    return %c0_i32, %c0_i32_0 : i32, i32
  }
  func.func @transform_2(%arg0: i32, %arg1: i32) -> (i32, i32, i32) {
    %c0_i32 = arith.constant 0 : i32
    %c0_i32_0 = arith.constant 0 : i32
    %c0_i32_1 = arith.constant 0 : i32
    return %arg0, %c0_i32, %c0_i32_0 : i32, i32, i32
  }
}

</mosaic_0001>

<bundles_post_ra>
// kernel: tpu_custom_call.1
= control target key start
LH: loop header
LB: loop body
LE: loop exit
PB: predicated region body
PF: predicated region fallthrough
CT: control target
= control target key end

     0   :  { %7 = vsyncpa [#allocation4], 0  ;;  %s889_s0 = inlined_call_operand.hbm [shape: f32[2,3,16,16], index: 0, kind: input, shape index: {}]   ;;  %s890_s1 = inlined_call_operand.hbm [shape: f32[8,128], index: 1, kind: input, shape index: {}]   ;;  %s891_s2 = inlined_call_operand.hbm [shape: f32[2,1,128], index: 2, kind: output, shape index: {}]  }
   0x1   :  { %9 = vsyncpa [#allocation4 + $0x1], 0 }
   0x2   :  { %10 = vsyncpa [#allocation7], 0 }
   0x3   :  { %11 = vsyncpa [#allocation5], 0 }
   0x4   :  { %13 = vsyncpa [#allocation5 + $0x1], 0  ;;  %s667_s9 = smov 0   ;;  %s669_s10 = smov 0  }
   0x5   :  { %s671_s11 = smov 0   ;;  %s673_s12 = smov 0  }
   0x6   :  { %s675_s13 = smov 0   ;;  %s677_s14 = smov 0  }
   0x7 LB: > { %s402_s15 = sadd.s32 4294967295, %s643_s14   ;;  %s403_s16 = sadd.s32 4294967294, %s643_s14   ;;  %s643_s14 = sphi %s677_s14, %s19_s14   ;;  %s639_s13 = sphi %s675_s13, %s919_s13   ;;  %s635_s12 = sphi %s673_s12, %s918_s12   ;;  %s631_s11 = sphi %s671_s11, %s917_s11   ;;  %s627_s10 = sphi %s669_s10, %s916_s10   ;;  %s623_s9 = sphi %s667_s9, %s915_s9  }
   0x8   : > { %s40_s17 = sadd.s32 1, %s631_s11  ;;  %p47_p0 = scmp.ne.s32.totalorder %s631_s11, %s627_s10 }
   0x9   : > { %p48_p1 = scmp.eq.s32.totalorder %s643_s14, 0  ;;  %p53_p2 = scmp.ne.s32.totalorder %s627_s10, %s623_s9 }
   0xa   : > { %p705_p3 = scmp.eq.s32.totalorder %s402_s15, 0  ;;  %p98_p4 = scmp.eq.s32.totalorder %s402_s15, 1 }
   0xb   : > { %p709_p5 = por %p48_p1, %p47_p0  ;;  %p104_p6 = scmp.eq.s32.totalorder %s403_s16, 1 }
   0xc   : > { %s898_s18 = scalar_select %p705_p3, 1, 0 }
   0xd   : > { %p715_p7 = por %p705_p3, %p53_p2  ;;  %p719_p8 = por %p98_p4, %p47_p0 }
   0xe   : > { %p723_p9 = por %p104_p6, %p53_p2  ;;  %p404_p10 = scmp.ge.s32.totalorder %s643_s14, 1 }
   0xf   : > { %s900_s20 = scalar_select %p715_p7, 1, 0 }
  0x10   : > { %s901_s21 = scalar_select %p719_p8, 1, 0 }
  0x11   : > { %s902_s22 = scalar_select %p723_p9, 1, 0 }
  0x12   : > { %p111_p11 = scmp.lt.s32.totalorder %s643_s14, 3  ;;  %s645_s24 = smov [#allocation6]  }
  0x13   : > { %s124_s25 = sshll.u32 %s645_s24, 4  ;;  %p437_p1 = scmp.lt.s32.totalorder %s643_s14, 2  ;;  %s125_s25 = int_to_ptr.vmem [resolvable:$true] %s124_s25 }
  0x14   : > { %p730_p13 = pnand %p404_p10, %p111_p11  ;;  %s31_s28 = sadd.s32 1, %s639_s13 }
  0x15   : > { %p739_p4 = pnand %p437_p1, %p709_p5  ;;  %p750_p6 = scmp.ge.s32.totalorder %s31_s28, 2 }
  0x16   : > { %s903_s23 = scalar_select %p730_p13, 1, 0 }
  0x17   : > { %p424_p0 = pneg %p730_p13  ;;  %s135_s30 = sand.u32 1, %s631_s11  }
  0x18   : > { %s904_s26 = scalar_select %p739_p4, 1, 0 }
  0x19   : > { %p745_p2 = pnand %p424_p0, %p705_p3  ;;  %s499_s5 = scalar_lea.hbm %s890_s1, 128 }
  0x1a   : > { %s906_s29 = scalar_select %p750_p6, 1, 0 }
  0x1b   : > { %p500_p5 = scmp.ne.s32.totalorder %s890_s1, %s499_s5  ;;  %p501_p10 = pneg %p745_p2 }
  0x1c   : > { %p506_p0 = scmp.lt.u32.totalorder %s499_s5, %s890_s1 }
  0x1d   : > { %p502_p11 = pnand %p501_p10, %p500_p5 }
  0x1f   : > { %p503_p1 = pneg %p502_p11 }
  0x21   : > { %p508_p12 = pnand %p506_p0, %p503_p1 }
  0x23   : > { %511 = shalt.err (!%p508_p12)
}
  0x24   : > { %s512_s16 = scalar_lea.vmem %s125_s25, 128  ;;  %p520_p7 = scmp.lt.s32.totalorder %s125_s25, %s125_s25 }
  0x25   : > { %p513_p9 = scmp.ne.s32.totalorder %s125_s25, %s512_s16  ;;  %p521_p13 = scmp.lt.s32.totalorder %s512_s16, %s512_s16 }
  0x27   : > { %p515_p8 = pnand %p513_p9, %p501_p10  ;;  %p522_p4 = por %p521_p13, %p520_p7 }
  0x29   : > { %p516_p3 = pneg %p515_p8 }
  0x2b   : > { %p523_p6 = pnand %p522_p4, %p516_p3 }
  0x2d   : > { %526 = shalt.err (!%p523_p6)
}
  0x2e   : > { %427 = dma.hbm_to_vmem [thread:$0]  (!%p745_p2), %s890_s1, 128, %s125_s25, [#allocation7]  }
  0x2f   : > { %p907_p9 = scmp.ne.s32.totalorder %s906_s29, 0  ;;  %s413_s3 = smul.u32 48, %s135_s30 }
  0x30   : > { %s414_s5 = smul.u32 768, %s639_s13  ;;  %s790_s29 = scalar_lea.sflag [#allocation4], %s135_s30 }
  0x31   : > { %s921_s28 = smov (%p907_p9, %s31_s28), 0  ;;  %s139_s8 = scalar_lea.vmem [#allocation3], %s413_s3 }
  0x32   : > { %s35_s4 = ssub.s32 %s639_s13, %s921_s28  ;;  %s781_s7 = scalar_lea.hbm %s889_s0, %s414_s5 }
  0x33   : > { %p38_p3 = scmp.eq.s32.totalorder %s35_s4, 0  ;;  %s148_s15 = sshll.u32 %s139_s8, 4  ;;  %s788_s15 = int_to_ptr.vmem [resolvable:$true] %s148_s15 }
  0x34   : > { %s527_s16 = scalar_lea.hbm %s781_s7, 768  ;;  %p908_p8 = scmp.ne.s32.totalorder %s904_s26, 0 }
  0x35   : > { %s786_s25 = scalar_select %p38_p3, %s631_s11, %s40_s17  }
  0x36   : > { %p528_p7 = scmp.ne.s32.totalorder %s781_s7, %s527_s16  ;;  %p529_p12 = pneg %p908_p8 }
  0x37   : > { %s532_s3 = scalar_lea.hbm %s889_s0, 1536  ;;  %p533_p2 = scmp.lt.u32.totalorder %s781_s7, %s889_s0 }
  0x38   : > { %p530_p13 = pnand %p529_p12, %p528_p7  ;;  %p534_p6 = scmp.lt.u32.totalorder %s532_s3, %s527_s16 }
  0x39   : > { %p536_p10 = scmp.lt.u32.totalorder %s527_s16, %s781_s7 }
  0x3a   : > { %p531_p4 = pneg %p530_p13  ;;  %p535_p5 = por %p534_p6, %p533_p2 }
  0x3c   : > { %p537_p11 = por %p536_p10, %p535_p5 }
  0x3e   : > { %p538_p1 = pnand %p537_p11, %p531_p4 }
  0x40   : > { %541 = shalt.err (!%p538_p1)
}
  0x41   : > { %s542_s17 = scalar_lea.vmem %s788_s15, 768  ;;  %s646_s30 = smov [#allocation3]  }
  0x42   : > { %p543_p0 = scmp.ne.s32.totalorder %s788_s15, %s542_s17  ;;  %s547_s27 = sshll.u32 %s646_s30, 4  ;;  %s548_s27 = int_to_ptr.vmem [resolvable:$false] %s547_s27 }
  0x43   : > { %s549_s6 = scalar_lea.vmem %s548_s27, 1536  ;;  %p550_p7 = scmp.lt.s32.totalorder %s788_s15, %s548_s27 }
  0x44   : > { %p545_p9 = pnand %p543_p0, %p529_p12  ;;  %p551_p13 = scmp.lt.s32.totalorder %s549_s6, %s542_s17 }
  0x46   : > { %p546_p3 = pneg %p545_p9  ;;  %p552_p2 = por %p551_p13, %p550_p7 }
  0x48   : > { %p553_p6 = pnand %p552_p2, %p546_p3 }
  0x4a   : > { %556 = shalt.err (!%p553_p6)
}
  0x4b   : > { %s647_s8 = smov 128   ;;  %s648_s16 = smov 8  }
  0x4c   : > { %431 = dma.hbm_to_vmem [thread:$0]  (!%p908_p8), %s781_s7, 768, %s788_s15, %s790_s29, %s647_s8, %s647_s8, %s648_s16  }
  0x4d   : > { %p909_p12 = scmp.ne.s32.totalorder %s903_s23, 0 }
  0x4e   : > { %s821_s19 = sand.u32 (!%p909_p12), 1, %s627_s10   ;;  %p910_p4 = scmp.ne.s32.totalorder (!%p909_p12), %s900_s20, 0 }
  0x4f   : > { %160 = sbr.rel (%p909_p12) target bundleno = 719 (0x2cf), region = 28  ;;  %s163_s3 = scalar_lea.sflag (!%p909_p12), [#allocation4], %s821_s19 }
  0x50   : > { %s415_s24 = smul.u32 (!%p909_p12), 48, %s821_s19 }
  0x52   : > { %s166_s4 = scalar_lea.vmem (!%p909_p12), [#allocation3], %s415_s24 }
  0x56   : > { %610 = dma.done.wait (%p910_p4), %s163_s3, 768  }
  0x57   : > { %612 = vsyncadd (%p910_p4), %s163_s3, 4294966528  ;;  %p911_p5 = scmp.ne.s32.totalorder %s898_s18, 0 }
  0x59   : > { %614 = dma.done.wait (%p911_p5), [#allocation7], 128  }
  0x5a   : > { %616 = vsyncadd (%p911_p5), [#allocation7], 4294967168  ;;  %vm195_vm0 = vcmask 2048   ;;  %v649_v0 = vmov 0.0   ;;  %vm203_vm1 = vcmask 130048   ;;  %v197_v1 = vld [vmem:[%s166_s4] sm:$0xff] }
  0x5b   : > { %196 = vst.msk [vmem:[#allocation2] sm:$0x7] %vm195_vm0, %v649_v0  ;;  %v198_v2 = vld [vmem:[%s166_s4 + $0x8] sm:$0xff]  ;;  %v199_v3 = vld [vmem:[%s166_s4 + $0x10] sm:$0xff]  ;;  %v200_v4 = vld [vmem:[%s166_s4 + $0x18] sm:$0xff]  ;;  %v204_v7 = vsel %vm203_vm1, %v197_v1, 0.0 }
  0x5c   : > { %v201_v5 = vld [vmem:[%s166_s4 + $0x20] sm:$0xff]  ;;  %v202_v6 = vld [vmem:[%s166_s4 + $0x28] sm:$0xff]  ;;  %v205_v8 = vsel %vm203_vm1, %v198_v2, 0.0  ;;  %v213_v9 = vsel %vm203_vm1, %v199_v3, 0.0  ;;  %v214_v11 = vsel %vm203_vm1, %v200_v4, 0.0  ;;  %vm235_vm2 = vcmask 1041409  }
  0x5d   : > { %v206_v10 = vadd.f32 %v205_v8, %v204_v7  ;;  %v222_v12 = vsel %vm203_vm1, %v201_v5, 0.0  ;;  %v223_v13 = vsel %vm203_vm1, %v202_v6, 0.0  ;;  %v215_v14 = vadd.f32 %v214_v11, %v213_v9  ;;  %v253_v47 = vld [vmem:[#allocation6] sm:$0x1]  ;;  %v263_v48 = vld [vmem:[#allocation6 + $0x1] sm:$0x1] }
  0x5e   : > { %v224_v15 = vadd.f32 %v223_v13, %v222_v12  ;;  %vm237_vm3 = vcmask 1042434   ;;  %vm240_vm4 = vcmask 124928   ;;  %v650_v37 = vmov 0   ;;  %v250_v50 = vld [vmem:[#allocation6 + $0x4] sm:$0x1]  ;;  %s189_s18 = scalar_lea.vmem [#allocation8], %s821_s19 }
  0x5f   : > { %v207_v16 = vrot.slane %v206_v10, 4  ;;  %v216_v17 = vrot.slane %v215_v14, 4  ;;  %494 = vset.pattern.permute.xlu1 %v650_v37  ;;  %493 = vset.pattern.permute.xlu0 %v650_v37  ;;  %v273_v53 = vld [vmem:[#allocation6 + $0x2] sm:$0x1]  ;;  %v282_v60 = vld [vmem:[#allocation6 + $0x5] sm:$0x1] }
  0x60   : > { %v225_v18 = vrot.slane %v224_v15, 4  ;;  %vm284_vm5 = vcmask 1040384   ;;  %v288_v0 = vld [vmem:[#allocation6 + $0x6] sm:$0x1]  ;;  %s315_s20 = sshll.u32 %s189_s18, 4  ;;  %s410_s23 = sshll.u32 %s635_s12, 4  ;;  %s837_s20 = int_to_ptr.vmem [resolvable:$true] %s315_s20 }
  0x61   : > { %v208_v19 = vadd.f32 %v207_v16, %v206_v10  ;;  %v217_v20 = vadd.f32 %v216_v17, %v215_v14  ;;  %s842_s15 = scalar_lea.hbm %s891_s2, %s410_s23  ;;  %s303_s29 = scalar_lea.sflag [#allocation5], %s821_s19 }
  0x62   : > { %v226_v21 = vadd.f32 %v225_v18, %v224_v15  ;;  %v231_v38 = vld [vmem:[#allocation2] sm:$0x7]  ;;  %s557_s5 = scalar_lea.vmem %s837_s20, 16  ;;  %p912_p10 = scmp.ne.s32.totalorder %s901_s21, 0 }
  0x63   : > { %v209_v22 = vrot.slane %v208_v19, 2  ;;  %v218_v23 = vrot.slane %v217_v20, 2  ;;  %p558_p8 = scmp.ne.s32.totalorder %s837_s20, %s557_s5  ;;  %s651_s17 = smov [#allocation8]  }
  0x64   : > { %v227_v24 = vrot.slane %v226_v21, 2  ;;  %s561_s12 = sshll.u32 %s651_s17, 4  ;;  %s562_s12 = int_to_ptr.vmem [resolvable:$false] %s561_s12 }
  0x65   : > { %v210_v25 = vadd.f32 %v209_v22, %v208_v19  ;;  %v219_v26 = vadd.f32 %v218_v23, %v217_v20  ;;  %p559_p11 = pnand %p558_p8, %p912_p10  ;;  %s563_s30 = scalar_lea.vmem %s562_s12, 32 }
  0x66   : > { %v228_v27 = vadd.f32 %v227_v24, %v226_v21  ;;  %p564_p0 = scmp.lt.s32.totalorder %s837_s20, %s562_s12  ;;  %p565_p9 = scmp.lt.s32.totalorder %s563_s30, %s557_s5 }
  0x67   : > { %v211_v28 = vrot.slane %v210_v25, 1  ;;  %v220_v29 = vrot.slane %v219_v26, 1  ;;  %p560_p1 = pneg %p559_p11 }
  0x68   : > { %v229_v30 = vrot.slane %v228_v27, 1  ;;  %p566_p3 = por %p565_p9, %p564_p0 }
  0x69   : > { %v212_v31 = vadd.f32 %v211_v28, %v210_v25  ;;  %v221_v32 = vadd.f32 %v220_v29, %v219_v26 }
  0x6a   : > { %v230_v33 = vadd.f32 %v229_v30, %v228_v27  ;;  %p567_p7 = pnand %p566_p3, %p560_p1 }
  0x6b   : > { %v236_v34 = vsel %vm235_vm2, %v221_v32, %v212_v31 }
  0x6c   : > { %v238_v35 = vsel %vm237_vm3, %v230_v33, %v236_v34 }
  0x6d   : > { %v241_v36 = vsel %vm240_vm4, %v238_v35, 0.0 }
  0x6e   : > { %242 = vadd.xlane.f32.xlu0 %v241_v36 }
  0xfb   : > { %v243_v39 = vpop.xlane.xlu0 %242 }
  0xfc   : > { %v244_v40 = vadd.f32 %v243_v39, %v231_v38 }
  0xfe   : > { %246 = vst.msk [vmem:[#allocation2] sm:$0x7] %vm195_vm0, %v244_v40 }
 0x105   : > { %v261_v41 = vld [vmem:[#allocation2 + $0x1] sm:$0x1]  ;;  %v251_v42 = vld [vmem:[#allocation2] sm:$0x1]  ;;  %v271_v45 = vld [vmem:[#allocation2 + $0x2] sm:$0x1] }
 0x106   : > { %v262_v43 = vmul.f32 0.00390625, %v261_v41  ;;  %v252_v44 = vmul.f32 0.00390625, %v251_v42  ;;  %v272_v46 = vmul.f32 0.00390625, %v271_v45 }
 0x108   : > { %266 = vperm.xlu1 %494, %v262_v43   ;;  %256 = vperm.xlu0 %493, %v252_v44  }
 0x10c   : > { %276 = vperm.xlu1 %494, %v272_v46  }
 0x187   : > { %v267_v49 = vpop.permute.xlu1 %266  ;;  %v257_v51 = vpop.permute.xlu0 %256 }
 0x188   : > { %v259_v52 = vmul.f32 %v257_v51, %v253_v47  ;;  %v269_v54 = vmul.f32 %v267_v49, %v263_v48 }
 0x18a   : > { %v260_v55 = vadd.f32 %v259_v52, %v250_v50 }
 0x18b   : > { %v277_v56 = vpop.permute.xlu1 %276 }
 0x18c   : > { %v270_v57 = vadd.f32 %v269_v54, %v260_v55  ;;  %v279_v58 = vmul.f32 %v277_v56, %v273_v53 }
 0x18e   : > { %v280_v59 = vadd.f32 %v279_v58, %v270_v57 }
 0x190   : > { %v281_v61 = vmax.f32 %v280_v59, 0.0 }
 0x192   : > { %v283_v62 = vmul.f32 %v282_v60, %v281_v61 }
 0x194   : > { %v285_v63 = vsel %vm284_vm5, %v283_v62, 0.0 }
 0x195   : > { %286 = vadd.xlane.f32.xlu1 %v285_v63 }
 0x222   : > { %v287_v1 = vpop.xlane.xlu1 %286 }
 0x223   : > { %v289_v2 = vadd.f32 %v288_v0, %v287_v1 }
 0x225   : > { %v290_v3 = vsub.f32 0.0, %v289_v2 }
 0x227   : > { %v291_v4 = vmul.f32 1.442695, %v290_v3 }
 0x229   : > { %495 = vpow2.f32 %v291_v4 }
 0x233   : > { %v496_v5 = vpop.eup %495 }
 0x234   : > { %v293_v6 = vadd.f32 1.0, %v496_v5 }
 0x236   : > { %497 = vrcp.f32 %v293_v6 }
 0x240   : > { %v498_v7 = vpop.eup %497 }
 0x241   : > { %298 = vperm.xlu1 %494, %v498_v7  }
 0x2c0   : > { %v299_v8 = vpop.permute.xlu1 %298 }
 0x2c1   : > { %301 = vst [vmem:[%s189_s18] sm:$0x1] %v299_v8 }
 0x2c2   : > { %570 = shalt.err (!%p567_p7)
}
 0x2c3   : > { %s571_s27 = scalar_lea.hbm %s842_s15, 16  ;;  %s575_s16 = scalar_lea.hbm %s891_s2, 32 }
 0x2c4   : > { %p572_p13 = scmp.ne.s32.totalorder %s842_s15, %s571_s27  ;;  %p576_p12 = scmp.lt.u32.totalorder %s842_s15, %s891_s2 }
 0x2c5   : > { %p577_p4 = scmp.lt.u32.totalorder %s575_s16, %s571_s27  ;;  %p579_p8 = scmp.lt.u32.totalorder %s571_s27, %s842_s15 }
 0x2c6   : > { %p573_p2 = pnand %p572_p13, %p912_p10 }
 0x2c7   : > { %p578_p5 = por %p577_p4, %p576_p12 }
 0x2c8   : > { %p574_p6 = pneg %p573_p2 }
 0x2c9   : > { %p580_p11 = por %p579_p8, %p578_p5 }
 0x2cb   : > { %p581_p1 = pnand %p580_p11, %p574_p6 }
 0x2cd   : > { %584 = shalt.err (!%p581_p1)
}
 0x2ce   : > { %422 = dma.vmem_to_hbm [thread:$0]  (%p912_p10), %s837_s20, 16, %s842_s15, %s303_s29  }
 0x2cf PF: > { %s327_s3 = sand.u32 1, %s623_s9   ;;  %p913_p0 = scmp.ne.s32.totalorder %s902_s22, 0 }
 0x2d0   : > { %p914_p9 = scmp.ge.s32.totalorder %s643_s14, 2  ;;  %s328_s4 = scalar_lea.sflag [#allocation5], %s327_s3 }
 0x2d2   : > { %p433_p3 = pnand %p914_p9, %p913_p0 }
 0x2d4   : > { %618 = dma.done.wait (!%p433_p3), %s328_s4, 16  }
 0x2d5   : > { %620 = vsyncadd (!%p433_p3), %s328_s4, 4294967280  ;;  %s19_s14 = sadd.s32 1, %s643_s14   ;;  %s915_s9 = smov %s627_s10 }
 0x2d6   : > { %p16_p7 = scmp.ge.s32.totalorder %s19_s14, 4   ;;  %s916_s10 = smov %s631_s11 }
 0x2d7   : > { %s917_s11 = smov %s786_s25  ;;  %s918_s12 = smov %s639_s13 }
 0x2d8   : > { %s919_s13 = smov %s921_s28  ;;  %18 = sbr.rel (!%p16_p7) target bundleno = 7 (0x7), region = 85 }
 0x2df   :  { %332 = vsyncpa [#allocation4], 1 }
 0x2e0   :  { %334 = vsyncpa [#allocation4 + $0x1], 1 }
 0x2e1   :  { %335 = vsyncpa [#allocation7], 1 }
 0x2e2   :  { %336 = vsyncpa [#allocation5], 1 }
 0x2e3   :  { %338 = vsyncpa [#allocation5 + $0x1], 1 }

</bundles_post_ra>
